<compile_context>
chip_gen: v5e
topology: v5e:2x2
jax: 0.10.0
libtpu: 0.0.40
codegen_flags: <defaults>
</compile_context>

<pallas_src>
import jax
import jax.numpy as jnp
from jax.experimental import pallas as pl
from jax.experimental.pallas import tpu as pltpu


def _normalize_kernel(mean_ref, std_ref, x_ref, o_ref):
    # mean_ref / std_ref: (rows, 1) VMEM tiles aligned with the row blocking of x.
    # One small (rows, 1) reciprocal per block, then a single sub + mul per vreg.
    inv = 1.0 / std_ref[...]
    o_ref[...] = (x_ref[...] - mean_ref[...]) * inv


def _choose_block(R, L, itemsize, target_bytes=2 * 1024 * 1024):
    """Pick a lane-dense (rows, lane) tile of ~target_bytes that satisfies the
    TPU (8, 128) block rule (each dim a multiple of 8/128 or the full extent)."""
    min_rows = R if R < 8 else 8
    if L % 128 == 0:
        lane_cap = max(128, (target_bytes // (min_rows * itemsize)) // 128 * 128)
        lane = min(L, lane_cap)
    else:
        # Full last dim is always a legal block extent (handles odd H*W).
        lane = L
    rows_budget = max(1, target_bytes // (lane * itemsize))
    if rows_budget >= R or R < 8:
        rows = R
    else:
        rows = max(8, (rows_budget // 8) * 8)
    return rows, lane


def normalization(x: jax.Array, mean: jax.Array, std: jax.Array) -> jax.Array:
    """(x - mean[None, :, None, None]) / std[None, :, None, None]  (NCHW)."""
    B, C, H, W = x.shape
    R, L = B * C, H * W

    # Lane-dense view: each (b, c) spatial plane becomes one length-(H*W) row.
    x2 = x.reshape(R, L)
    # Per-row (i.e. per (b, c)) mean / std, aligned with the row tiling.
    # These are tiny ((B*C, 1)); the tile/reshape is negligible wrapper work.
    mean_rows = jnp.tile(mean.astype(x.dtype), (B,)).reshape(R, 1)
    std_rows = jnp.tile(std.astype(x.dtype), (B,)).reshape(R, 1)

    rows, lane = _choose_block(R, L, x.dtype.itemsize)
    grid = (pl.cdiv(R, rows), pl.cdiv(L, lane))

    out2 = pl.pallas_call(
        _normalize_kernel,
        out_shape=jax.ShapeDtypeStruct((R, L), x.dtype),
        grid_spec=pltpu.PrefetchScalarGridSpec(
            num_scalar_prefetch=0,
            grid=grid,
            in_specs=[
                pl.BlockSpec((rows, 1), lambda i, j: (i, 0)),      # mean rows
                pl.BlockSpec((rows, 1), lambda i, j: (i, 0)),      # std rows
                pl.BlockSpec((rows, lane), lambda i, j: (i, j)),   # x tile
            ],
            out_specs=pl.BlockSpec((rows, lane), lambda i, j: (i, j)),
        ),
        compiler_params=pltpu.CompilerParams(
            dimension_semantics=("parallel", "parallel"),
        ),
    )(mean_rows, std_rows, x2)

    return out2.reshape(B, C, H, W)


if __name__ == "__main__":
    key = jax.random.PRNGKey(0)
    kx, km, ks = jax.random.split(key, 3)

    B, C, H, W = 2, 4, 16, 16
    x = jax.random.normal(kx, (B, C, H, W), dtype=jnp.float32)
    # Deterministic per-channel mean/std (std strictly positive).
    mean = jax.random.normal(km, (C,), dtype=jnp.float32) * 0.5
    std = jax.random.uniform(ks, (C,), dtype=jnp.float32, minval=0.5, maxval=1.5)

    out = normalization(x, mean, std)
    out = jax.block_until_ready(out)

    # Reference in plain JAX (same broadcast semantics as PyTorch view(-1, 1, 1)).
    ref = (x - mean[None, :, None, None]) / std[None, :, None, None]
    # Multiply-by-reciprocal may differ from true division in the last ulp.
    assert jnp.allclose(out, ref, atol=1e-6, rtol=1e-5), "mismatch vs reference"

    print("KERNEL_OK")
</pallas_src>

<mosaic_0001>
module attributes {stable_mosaic.version = 11 : i64} {
  func.func @_normalize_kernel(%arg0: i32, %arg1: i32, %arg2: memref<8x1xf32, #tpu.memory_space<vmem>>, %arg3: memref<8x1xf32, #tpu.memory_space<vmem>>, %arg4: memref<8x256xf32, #tpu.memory_space<vmem>>, %arg5: memref<8x256xf32, #tpu.memory_space<vmem>>) attributes {dimension_semantics = [#tpu.dimension_semantics<parallel>, #tpu.dimension_semantics<parallel>], iteration_bounds = array<i64: 1, 1>, scalar_prefetch = 0 : i64, scratch_operands = 0 : i64, tpu.core_type = #tpu.core_type<tc>, window_params = [{transform_indices = @transform_0, window_bounds = array<i64: 8, 1>}, {transform_indices = @transform_1, window_bounds = array<i64: 8, 1>}, {transform_indices = @transform_2, window_bounds = array<i64: 8, 256>}, {transform_indices = @transform_3, window_bounds = array<i64: 8, 256>}]} {
    %c0 = arith.constant 0 : index
    %c0_0 = arith.constant 0 : index
    %0 = vector.load %arg3[%c0, %c0_0] : memref<8x1xf32, #tpu.memory_space<vmem>>, vector<8x1xf32>
    %cst = arith.constant 1.000000e+00 : f32
    %1 = vector.broadcast %cst : f32 to vector<8x1xf32>
    %2 = arith.divf %1, %0 : vector<8x1xf32>
    %c0_1 = arith.constant 0 : index
    %c0_2 = arith.constant 0 : index
    %3 = vector.load %arg4[%c0_1, %c0_2] : memref<8x256xf32, #tpu.memory_space<vmem>>, vector<8x256xf32>
    %c0_3 = arith.constant 0 : index
    %c0_4 = arith.constant 0 : index
    %4 = vector.load %arg2[%c0_3, %c0_4] : memref<8x1xf32, #tpu.memory_space<vmem>>, vector<8x1xf32>
    %5 = vector.broadcast %4 : vector<8x1xf32> to vector<8x256xf32>
    %6 = arith.subf %3, %5 : vector<8x256xf32>
    %7 = vector.broadcast %2 : vector<8x1xf32> to vector<8x256xf32>
    %8 = arith.mulf %6, %7 : vector<8x256xf32>
    %c0_5 = arith.constant 0 : index
    %c0_6 = arith.constant 0 : index
    %9 = vector.load %arg5[%c0_5, %c0_6] : memref<8x256xf32, #tpu.memory_space<vmem>>, vector<8x256xf32>
    tpu.vector_store %arg5[%c0_5, %c0_6], %8 {strides = array<i32>} : memref<8x256xf32, #tpu.memory_space<vmem>>, vector<8x256xf32>,
    return
  }
  func.func @transform_0(%arg0: i32, %arg1: i32) -> (i32, i32) {
    %c0_i32 = arith.constant 0 : i32
    %c0_i32_0 = arith.constant 0 : i32
    return %arg0, %c0_i32 : i32, i32
  }
  func.func @transform_1(%arg0: i32, %arg1: i32) -> (i32, i32) {
    %c0_i32 = arith.constant 0 : i32
    %c0_i32_0 = arith.constant 0 : i32
    return %arg0, %c0_i32 : i32, i32
  }
  func.func @transform_2(%arg0: i32, %arg1: i32) -> (i32, i32) {
    %c0_i32 = arith.constant 0 : i32
    return %arg0, %arg1 : i32, i32
  }
  func.func @transform_3(%arg0: i32, %arg1: i32) -> (i32, i32) {
    %c0_i32 = arith.constant 0 : i32
    return %arg0, %arg1 : i32, i32
  }
}

</mosaic_0001>

<bundles_post_ra>
// kernel: tpu_custom_call.1
= control target key start
LH: loop header
LB: loop body
LE: loop exit
PB: predicated region body
PF: predicated region fallthrough
CT: control target
= control target key end

     0   :  { %s134_s0 = inlined_call_operand.vmem [shape: f32[8,1], index: 0, kind: input, shape index: {}]   ;;  %s135_s1 = inlined_call_operand.vmem [shape: f32[8,1], index: 1, kind: input, shape index: {}]   ;;  %s136_s2 = inlined_call_operand.vmem [shape: f32[8,256], index: 2, kind: input, shape index: {}]   ;;  %s137_s3 = inlined_call_operand.hbm [shape: f32[8,256], index: 3, kind: output, shape index: {}]  }
   0x1   :  { %v33_v0 = vld [vmem:[%s134_s0] sm:$0xff] }
   0x2   :  { %v15_v1 = vld [vmem:[%s135_s1] sm:$0xff] }
   0x3   :  { %8 = vsyncpa [#allocation3], 0  ;;  %v97_v2 = vmov 0   ;;  %69 = vrcp.f32 %v15_v1  ;;  %v27_v5 = vand.u32 2147483648, %v15_v1  ;;  %vm21_vm0 = vweird.f32 %v15_v1  ;;  %v31_v14 = vld [vmem:[%s136_s2] sm:$0xff]  ;;  %v32_v15 = vld [vmem:[%s136_s2 + $0x8] sm:$0xff] }
   0x4   :  { %68 = vset.pattern.permute.xlu0 %v97_v2  ;;  %v25_v7 = vand.u32 2147483647, %v15_v1  ;;  %s98_s18 = smov [#allocation2]   ;;  %s57_s22 = sshll.u32 %s137_s3, 4  ;;  %s58_s22 = int_to_ptr.hbm [resolvable:$true] %s57_s22 }
   0x5   :  { %36 = vperm.xlu0 %68, %v33_v0   ;;  %v28_v9 = vor.u32 1.1754944e-38, %v27_v5  ;;  %s55_s19 = sshll.u32 %s98_s18, 4  ;;  %s56_s19 = int_to_ptr.vmem [resolvable:$true] %s55_s19 }
   0x6   :  { %vm26_vm3 = vcmp.eq.f32.partialorder %v25_v7, 8.507059e+37 }
   0x9   :  { %v70_v3 = vpop.eup %69 }
   0xa   :  { %v17_v4 = vmul.f32 %v70_v3, %v15_v1  ;;  %vm22_vm1 = vweird.f32 %v70_v3 }
   0xb   :  { %vm23_vm2 = vmor %vm21_vm0, %vm22_vm1 }
   0xc   :  { %v18_v6 = vsub.f32 1.0, %v17_v4 }
   0xe   :  { %v19_v8 = vmul.f32 %v70_v3, %v18_v6 }
  0x10   :  { %v20_v10 = vadd.f32 %v70_v3, %v19_v8 }
  0x12   :  { %v24_v11 = vsel %vm23_vm2, %v70_v3, %v20_v10 }
  0x13   :  { %v29_v12 = vsel %vm26_vm3, %v28_v9, %v24_v11 }
  0x14   :  { %43 = vperm.xlu0 %68, %v29_v12  }
  0x77   :  { %v37_v13 = vpop.permute.xlu0 %36 }
  0x78   :  { %v39_v16 = vsub.f32 %v31_v14, %v37_v13  ;;  %v40_v17 = vsub.f32 %v32_v15, %v37_v13 }
  0x86   :  { %v44_v18 = vpop.permute.xlu0 %43 }
  0x87   :  { %v46_v19 = vmul.f32 %v44_v18, %v39_v16  ;;  %v47_v20 = vmul.f32 %v44_v18, %v40_v17 }
  0x89   :  { %48 = vst [vmem:[#allocation2] sm:$0xff] %v46_v19 }
  0x8a   :  { %49 = vst [vmem:[#allocation2 + $0x8] sm:$0xff] %v47_v20 }
  0x8b   :  { %60 = dma.vmem_to_hbm [thread:$0]  %s56_s19, 256, %s58_s22, [#allocation3]  }
  0x8c   :  { %95 = dma.done.wait [#allocation3], 256  }
  0x8d   :  { %96 = vsyncadd [#allocation3], 4294967040 }
  0x8e   :  { %65 = vsyncpa [#allocation3], 1 }

</bundles_post_ra>
